<compile_context>
chip_gen: v7x
topology: tpu7x:2x2x1
jax: 0.10.0
libtpu: 0.0.40
codegen_flags: <defaults>
</compile_context>

<pallas_src>
import jax
import jax.numpy as jnp
from jax.experimental import pallas as pl
from jax.experimental.pallas import tpu as pltpu

LANES = 128
SUBLANES = 8
MIN_TILE_ROWS = 1024          # 512 KiB per f32 input block: floor for DMA size
SMALL_INPUT_BYTES = 1 << 20   # below this, plain-JAX fast path
VMEM_LIMIT_BYTES = 48 << 20   # safe on v5e/v6e (128 MiB phys) and v7x (64 MiB phys)


def _cdiv(a: int, b: int) -> int:
    return -(-a // b)


def _round_up(a: int, b: int) -> int:
    return _cdiv(a, b) * b


def _target_block_rows(itemsize: int) -> int:
    """Per-generation target rows so each input block is ~2-4 MiB."""
    try:
        kind = jax.devices()[0].device_kind.lower()
    except Exception:  # pragma: no cover - defensive; fall through to default
        kind = ""
    if "v5 lite" in kind or "v5e" in kind or "v5litepod" in kind:
        target_bytes = 2 << 20   # v5e: slower HBM, 2 MiB already amortizes overhead
    else:
        target_bytes = 4 << 20   # v6e / v7x / unknown
    return max(MIN_TILE_ROWS, target_bytes // (LANES * itemsize))


def _make_partial_sse_kernel(tile_rows: int, valid_rows: int, needs_mask: bool):
    n_sub = tile_rows // SUBLANES

    def kernel(x_ref, t_ref, partial_ref):
        d = x_ref[...].astype(jnp.float32) - t_ref[...].astype(jnp.float32)
        if needs_mask:
            # Pallas does NOT zero-fill the trailing partial block; mask rows
            # beyond the true extent.  VPU-only; hidden under DMA time.
            row0 = pl.program_id(0) * tile_rows
            rid = jax.lax.broadcasted_iota(jnp.int32, (tile_rows, LANES), 0) + row0
            d = jnp.where(rid < valid_rows, d, 0.0)
        sq = d * d
        # VPU-only partial reduce: (tile_rows,128) -> (n_sub,8,128) -> sum over
        # n_sub.  The reshape splits along (8,128) tile boundaries (no shuffle);
        # the only cross-lane reduce is done in the wrapper on a tiny array.
        partial_ref[...] = jnp.sum(sq.reshape(n_sub, SUBLANES, LANES), axis=0)[None]

    return kernel


def _as_lane_slab(arr: jax.Array):
    """Flatten to a lane-dense (rows, 128) slab.

    Free (pure reshape) when arr.size % 128 == 0; otherwise pads the flat tail
    to the next lane multiple (<=127 zero elements; they contribute 0 to SSE).
    """
    total = int(arr.size)
    flat = arr.reshape(-1)
    rows = _cdiv(total, LANES)
    pad = rows * LANES - total
    if pad:
        # TODO(synk): the rare non-128-aligned case still copies the array once;
        # a fully in-kernel lane mask would need a 1-D / element-offset BlockSpec.
        flat = jnp.pad(flat, (0, pad))
    return flat.reshape(rows, LANES), rows


def _partial_sse(x2d: jax.Array, t2d: jax.Array, rows: int, tile_rows: int):
    """Sum of squared differences over the valid `rows` of two (rows,128) slabs."""
    num_blocks = _cdiv(rows, tile_rows)
    needs_mask = (rows % tile_rows) != 0

    in_bytes = rows * LANES * (x2d.dtype.itemsize + t2d.dtype.itemsize)
    out_bytes = num_blocks * SUBLANES * LANES * 4
    cost = pl.CostEstimate(
        flops=3 * rows * LANES,
        transcendentals=0,
        bytes_accessed=in_bytes + out_bytes,
    )

    partials = pl.pallas_call(
        _make_partial_sse_kernel(tile_rows, rows, needs_mask),
        out_shape=jax.ShapeDtypeStruct((num_blocks, SUBLANES, LANES), jnp.float32),
        grid_spec=pl.GridSpec(
            grid=(num_blocks,),
            in_specs=[
                pl.BlockSpec((tile_rows, LANES), lambda i: (i, 0)),
                pl.BlockSpec((tile_rows, LANES), lambda i: (i, 0)),
            ],
            out_specs=pl.BlockSpec((1, SUBLANES, LANES), lambda i: (i, 0, 0)),
        ),
        compiler_params=pltpu.CompilerParams(
            dimension_semantics=("parallel",),   # no carried state -> megacore-safe
            vmem_limit_bytes=VMEM_LIMIT_BYTES,
        ),
        cost_estimate=cost,
    )(x2d, t2d)

    return jnp.sum(partials)


def make_content_loss(target: jax.Array):
    """Mirrors ContentLoss: stores the detached target once; forward(x) returns
    (x, mse_loss) — the loss is returned instead of stashed as module state."""
    target = jax.lax.stop_gradient(target)   # .detach()
    total = int(target.size)

    # Small-input fast path: pallas_call launch + secondary reduce would dominate.
    if total * jnp.dtype(target.dtype).itemsize < SMALL_INPUT_BYTES:
        def forward_small(x):
            assert x.shape == target.shape, "input/target shape mismatch"
            loss = jnp.mean(
                (x.astype(jnp.float32) - target.astype(jnp.float32)) ** 2)
            return x, loss
        return forward_small

    # Prepare the constant target slab ONCE (not every forward pass).
    t2d, rows = _as_lane_slab(target)

    # Block size: per-generation multi-MiB target, but keep >=4 grid steps for
    # megacore when the array allows; always a multiple of 32 rows.
    tile_rows = min(
        _target_block_rows(jnp.dtype(target.dtype).itemsize),
        max(MIN_TILE_ROWS, _round_up(_cdiv(rows, 4), 32)),
    )
    inv_total = jnp.float32(1.0 / total)

    def forward(x):
        assert x.shape == target.shape, "input/target shape mismatch"
        x2d, _ = _as_lane_slab(x)
        sse = _partial_sse(x2d, t2d, rows, tile_rows)
        # Pass-through identical to PyTorch `return input`; no kernel copy /
        # extra HBM write.  Loss accumulated in f32 (>= PyTorch precision).
        return x, sse * inv_total

    return forward


if __name__ == "__main__":
    key = jax.random.PRNGKey(0)
    k1, k2, k3, k4, k5, k6 = jax.random.split(key, 6)

    # 1) Small demo shape (module-consistent) -> plain-JAX fast path.
    shape_small = (2, 4, 16, 16)
    x_s = jax.random.normal(k1, shape_small, dtype=jnp.float32)
    t_s = jax.random.normal(k2, shape_small, dtype=jnp.float32)
    out_s, loss_s = jax.block_until_ready(make_content_loss(t_s)(x_s))
    assert jnp.allclose(out_s, x_s), "pass-through mismatch (small)"
    assert jnp.allclose(loss_s, jnp.mean((x_s - t_s) ** 2),
                        rtol=1e-6, atol=1e-6), "mse mismatch (small)"

    # 2) Conv-feature-map-sized input -> Pallas kernel path, 128-aligned
    #    (no wrapper pad, multiple full blocks, parallel grid).
    shape_big = (2, 64, 64, 64)
    x_b = jax.random.normal(k3, shape_big, dtype=jnp.float32)
    t_b = jax.random.normal(k4, shape_big, dtype=jnp.float32)
    out_b, loss_b = jax.block_until_ready(make_content_loss(t_b)(x_b))
    assert jnp.allclose(out_b, x_b), "pass-through mismatch (big)"
    assert jnp.allclose(loss_b, jnp.mean((x_b - t_b) ** 2),
                        rtol=1e-5, atol=1e-6), "mse mismatch (big)"

    # 3) Odd shape -> Pallas kernel path exercising in-kernel masking of the
    #    partial trailing block (rows not a multiple of tile_rows).
    shape_odd = (3, 33, 60, 61)
    x_o = jax.random.normal(k5, shape_odd, dtype=jnp.float32)
    t_o = jax.random.normal(k6, shape_odd, dtype=jnp.float32)
    out_o, loss_o = jax.block_until_ready(make_content_loss(t_o)(x_o))
    assert jnp.allclose(out_o, x_o), "pass-through mismatch (odd)"
    assert jnp.allclose(loss_o, jnp.mean((x_o - t_o) ** 2),
                        rtol=1e-5, atol=1e-6), "mse mismatch (odd)"

    print("KERNEL_OK")
</pallas_src>

<mosaic_0001>
module attributes {stable_mosaic.version = 11 : i64} {
  func.func @kernel(%arg0: i32, %arg1: memref<1024x128xf32, #tpu.memory_space<vmem>>, %arg2: memref<1024x128xf32, #tpu.memory_space<vmem>>, %arg3: memref<1x8x128xf32, #tpu.memory_space<vmem>>) attributes {dimension_semantics = [#tpu.dimension_semantics<parallel>], iteration_bounds = array<i64: 4>, scalar_prefetch = 0 : i64, scratch_operands = 0 : i64, tpu.core_type = #tpu.core_type<tc>, window_params = [{transform_indices = @transform_0, window_bounds = array<i64: 1024, 128>}, {transform_indices = @transform_1, window_bounds = array<i64: 1024, 128>}, {transform_indices = @transform_2, window_bounds = array<i64: 1, 8, 128>}]} {
    %c0 = arith.constant 0 : index
    %c0_0 = arith.constant 0 : index
    %0 = vector.load %arg1[%c0, %c0_0] : memref<1024x128xf32, #tpu.memory_space<vmem>>, vector<1024x128xf32>
    %c0_1 = arith.constant 0 : index
    %c0_2 = arith.constant 0 : index
    %1 = vector.load %arg2[%c0_1, %c0_2] : memref<1024x128xf32, #tpu.memory_space<vmem>>, vector<1024x128xf32>
    %2 = arith.subf %0, %1 : vector<1024x128xf32>
    %3 = arith.mulf %2, %2 : vector<1024x128xf32>
    %4 = vector.shape_cast %3 : vector<1024x128xf32> to vector<128x8x128xf32>
    %cst = arith.constant dense<0.000000e+00> : vector<8x128xf32>
    %5 = vector.multi_reduction <add>, %4, %cst [0] : vector<128x8x128xf32> to vector<8x128xf32>
    %6 = vector.shape_cast %5 : vector<8x128xf32> to vector<1x8x128xf32>
    %c0_3 = arith.constant 0 : index
    %c0_4 = arith.constant 0 : index
    %c0_5 = arith.constant 0 : index
    %7 = vector.load %arg3[%c0_3, %c0_4, %c0_5] : memref<1x8x128xf32, #tpu.memory_space<vmem>>, vector<1x8x128xf32>
    tpu.vector_store %arg3[%c0_3, %c0_4, %c0_5], %6 {strides = array<i32>} : memref<1x8x128xf32, #tpu.memory_space<vmem>>, vector<1x8x128xf32>,
    return
  }
  func.func @transform_0(%arg0: i32) -> (i32, i32) {
    %c0_i32 = arith.constant 0 : i32
    %c0_i32_0 = arith.constant 0 : i32
    return %arg0, %c0_i32 : i32, i32
  }
  func.func @transform_1(%arg0: i32) -> (i32, i32) {
    %c0_i32 = arith.constant 0 : i32
    %c0_i32_0 = arith.constant 0 : i32
    return %arg0, %c0_i32 : i32, i32
  }
  func.func @transform_2(%arg0: i32) -> (i32, i32, i32) {
    %c0_i32 = arith.constant 0 : i32
    %c0_i32_0 = arith.constant 0 : i32
    %c0_i32_1 = arith.constant 0 : i32
    return %arg0, %c0_i32, %c0_i32_0 : i32, i32, i32
  }
}

</mosaic_0001>

<bundles_post_ra>
// kernel: tpu_custom_call.1
= control target key start
LH: loop header
LB: loop body
LE: loop exit
PB: predicated region body
PF: predicated region fallthrough
CT: control target
= control target key end

     0   :  { %7 = vsyncpa [#allocation3], 0  ;;  %s1655_s0 = inlined_call_operand.hbm [shape: f32[4096,128], index: 0, kind: input, shape index: {}]   ;;  %s1656_s1 = inlined_call_operand.hbm [shape: f32[4096,128], index: 1, kind: input, shape index: {}]   ;;  %s1657_s2 = inlined_call_operand.hbm [shape: f32[4,8,128], index: 2, kind: output, shape index: {}]  }
   0x1   :  { %9 = vsyncpa [#allocation3 + $0x1], 0 }
   0x2   :  { %10 = vsyncpa [#allocation6], 0 }
   0x3   :  { %12 = vsyncpa [#allocation6 + $0x1], 0 }
   0x4   :  { %13 = vsyncpa [#allocation4], 0 }
   0x5   :  { %15 = vsyncpa [#allocation4 + $0x1], 0  ;;  %s1175_s9 = smov 0   ;;  %s1177_s10 = smov 0  }
   0x6   :  { %s1179_s11 = smov 0   ;;  %s1181_s12 = smov 0  }
   0x7 LB: > { %s1196_s13 = sadd.s32 4294967295, %s1153_s12   ;;  %s951_s14 = sadd.s32 4294967294, %s1153_s12   ;;  %s1153_s12 = sphi %s1181_s12, %s1672_s12   ;;  %s1149_s11 = sphi %s1179_s11, %s1671_s11   ;;  %s1145_s10 = sphi %s1177_s10, %s1670_s10   ;;  %s1141_s9 = sphi %s1175_s9, %s1669_s9  }
   0x8   : > { %s1200_s15 = sadd.s32 1, %s1153_s12   ;;  %s28_s16 = sadd.s32 1, %s1149_s11 }
   0x9   : > { %s25_s17 = ssub.s32 %s1153_s12, %s1200_s15  ;;  %p35_p0 = scmp.ne.s32.totalorder %s1149_s11, %s1145_s10 }
   0xa   : > { %p26_p1 = scmp.eq.s32.totalorder %s25_s17, 0  ;;  %p36_p2 = scmp.eq.s32.totalorder %s1153_s12, 0 }
   0xb   : > { %p41_p3 = scmp.ne.s32.totalorder %s1145_s10, %s1141_s9  ;;  %p42_p4 = scmp.eq.s32.totalorder %s1196_s13, 0 }
   0xc   : > { %s1212_s18 = scalar_select %p26_p1, %s1149_s11, %s28_s16  }
   0xd   : > { %p1214_p5 = por %p36_p2, %p35_p0  ;;  %p1218_p6 = por %p42_p4, %p41_p3 }
   0xe   : > { %p91_p7 = scmp.eq.s32.totalorder %s1196_s13, 3  ;;  %p97_p8 = scmp.eq.s32.totalorder %s951_s14, 3 }
   0xf   : > { %s1661_s20 = scalar_select %p1218_p6, 1, 0 }
  0x10   : > { %p987_p9 = scmp.lt.s32.totalorder %s1153_s12, 4  ;;  %p1224_p10 = por %p91_p7, %p35_p0 }
  0x11   : > { %p1228_p11 = por %p97_p8, %p41_p3  ;;  %s1233_s23 = sand.u32 1, %s1149_s11  }
  0x12   : > { %s1662_s21 = scalar_select %p1224_p10, 1, 0 }
  0x13   : > { %s1663_s22 = scalar_select %p1228_p11, 1, 0 }
  0x14   : > { %s968_s24 = sshll.u32 %s1153_s12, 14  ;;  %s954_s25 = sshll.u32 %s1233_s23, 10 }
  0x15   : > { %s1242_s28 = scalar_lea.hbm %s1655_s0, %s968_s24  ;;  %s121_s29 = scalar_lea.vmem [#allocation2], %s954_s25 }
  0x16   : > { %s128_s30 = sshll.u32 %s121_s29, 4  ;;  %p1248_p12 = pnand %p987_p9, %p1214_p5  ;;  %s1252_s30 = int_to_ptr.vmem [resolvable:$true] %s128_s30 }
  0x17   : > { %s118_s4 = scalar_lea.sflag [#allocation3], %s1233_s23  ;;  %s1023_s5 = scalar_lea.hbm %s1242_s28, 16384 }
  0x18   : > { %p1024_p13 = scmp.ne.s32.totalorder %s1242_s28, %s1023_s5  ;;  %p1025_p0 = pneg %p1248_p12 }
  0x19   : > { %s1028_s8 = scalar_lea.hbm %s1655_s0, 65536  ;;  %p1029_p3 = scmp.lt.u32.totalorder %s1242_s28, %s1655_s0 }
  0x1a   : > { %p1026_p1 = pnand %p1025_p0, %p1024_p13  ;;  %p1030_p4 = scmp.lt.u32.totalorder %s1028_s8, %s1023_s5 }
  0x1b   : > { %p1032_p7 = scmp.lt.u32.totalorder %s1023_s5, %s1242_s28 }
  0x1c   : > { %p1027_p2 = pneg %p1026_p1  ;;  %p1031_p5 = por %p1030_p4, %p1029_p3 }
  0x1e   : > { %p1033_p8 = por %p1032_p7, %p1031_p5 }
  0x20   : > { %p1034_p9 = pnand %p1033_p8, %p1027_p2 }
  0x22   : > { %1037 = shalt.err (!%p1034_p9)
}
  0x23   : > { %s1038_s17 = scalar_lea.vmem %s1252_s30, 16384  ;;  %s1155_s19 = smov [#allocation2]  }
  0x24   : > { %p1039_p13 = scmp.ne.s32.totalorder %s1252_s30, %s1038_s17  ;;  %s1043_s26 = sshll.u32 %s1155_s19, 4  ;;  %s1044_s26 = int_to_ptr.vmem [resolvable:$false] %s1043_s26 }
  0x25   : > { %s1045_s27 = scalar_lea.vmem %s1044_s26, 32768  ;;  %p1046_p10 = scmp.lt.s32.totalorder %s1252_s30, %s1044_s26 }
  0x26   : > { %p1041_p1 = pnand %p1039_p13, %p1025_p0  ;;  %p1047_p3 = scmp.lt.s32.totalorder %s1045_s27, %s1038_s17 }
  0x28   : > { %p1042_p11 = pneg %p1041_p1  ;;  %p1048_p4 = por %p1047_p3, %p1046_p10 }
  0x2a   : > { %p1049_p5 = pnand %p1048_p4, %p1042_p11 }
  0x2c   : > { %1052 = shalt.err (!%p1049_p5)
}
  0x2d   : > { %s1156_s29 = smov 128   ;;  %s1157_s5 = smov 8  }
  0x2e   : > { %979 = dma.hbm_to_vmem [thread:$0]  (!%p1248_p12), %s1242_s28, 16384, %s1252_s30, %s118_s4, %s1156_s29, %s1156_s29, %s1157_s5  }
  0x2f   : > { %p960_p10 = scmp.ge.s32.totalorder %s1153_s12, 1  ;;  %p157_p11 = scmp.lt.s32.totalorder %s1153_s12, 5 }
  0x30   : > { %s1296_s14 = scalar_lea.hbm %s1656_s1, %s968_s24  ;;  %s142_s16 = scalar_lea.vmem [#allocation5], %s954_s25 }
  0x31   : > { %p1287_p2 = pnand %p960_p10, %p157_p11  ;;  %s149_s17 = sshll.u32 %s142_s16, 4  ;;  %s1300_s17 = int_to_ptr.vmem [resolvable:$true] %s149_s17 }
  0x32   : > { %s139_s28 = scalar_lea.sflag [#allocation6], %s1233_s23  ;;  %s1053_s30 = scalar_lea.hbm %s1296_s14, 16384 }
  0x33   : > { %p1054_p7 = scmp.ne.s32.totalorder %s1296_s14, %s1053_s30  ;;  %s1058_s24 = scalar_lea.hbm %s1656_s1, 65536 }
  0x34   : > { %p1059_p13 = scmp.lt.u32.totalorder %s1296_s14, %s1656_s1  ;;  %p1060_p1 = scmp.lt.u32.totalorder %s1058_s24, %s1053_s30 }
  0x35   : > { %p1056_p8 = pnand %p1054_p7, %p1025_p0  ;;  %p1062_p4 = scmp.lt.u32.totalorder %s1053_s30, %s1296_s14 }
  0x36   : > { %p1061_p3 = por %p1060_p1, %p1059_p13 }
  0x37   : > { %p1057_p9 = pneg %p1056_p8 }
  0x38   : > { %p1063_p5 = por %p1062_p4, %p1061_p3 }
  0x3a   : > { %p1064_p10 = pnand %p1063_p5, %p1057_p9 }
  0x3c   : > { %1067 = shalt.err (!%p1064_p10)
}
  0x3d   : > { %s1068_s25 = scalar_lea.vmem %s1300_s17, 16384  ;;  %s1158_s7 = smov [#allocation5]  }
  0x3e   : > { %p1069_p11 = scmp.ne.s32.totalorder %s1300_s17, %s1068_s25  ;;  %s1073_s8 = sshll.u32 %s1158_s7, 4  ;;  %s1074_s8 = int_to_ptr.vmem [resolvable:$false] %s1073_s8 }
  0x3f   : > { %s1075_s16 = scalar_lea.vmem %s1074_s8, 32768  ;;  %p1076_p6 = scmp.lt.s32.totalorder %s1300_s17, %s1074_s8 }
  0x40   : > { %p1071_p7 = pnand %p1069_p11, %p1025_p0  ;;  %p1077_p13 = scmp.lt.s32.totalorder %s1075_s16, %s1068_s25 }
  0x42   : > { %p1072_p8 = pneg %p1071_p7  ;;  %p1078_p1 = por %p1077_p13, %p1076_p6 }
  0x44   : > { %p1079_p3 = pnand %p1078_p1, %p1072_p8 }
  0x46   : > { %1082 = shalt.err (!%p1079_p3)
}
  0x47   : > { %982 = dma.hbm_to_vmem [thread:$0]  (!%p1248_p12), %s1296_s14, 16384, %s1300_s17, %s139_s28, %s1156_s29, %s1156_s29, %s1157_s5  }
  0x48   : > { %161 = sbr.rel (%p1287_p2) target bundleno = 356 (0x164), region = 28  ;;  %s1334_s30 = sand.u32 (!%p1287_p2), 1, %s1145_s10  }
  0x49   : > { %s961_s4 = sshll.u32 (!%p1287_p2), %s1334_s30, 10  ;;  %s164_s19 = scalar_lea.sflag (!%p1287_p2), [#allocation3], %s1334_s30 }
  0x4a   : > { %s1338_s3 = scalar_lea.vmem (!%p1287_p2), [#allocation2], %s961_s4  ;;  %p1666_p6 = scmp.ne.s32.totalorder (!%p1287_p2), %s1661_s20, 0 }
  0x4f   : > { %1128 = dma.done.wait (%p1666_p6), %s164_s19, 16384  }
  0x50   : > { %1130 = vsyncadd (%p1666_p6), %s164_s19, 4294950912  ;;  %s173_s23 = scalar_lea.sflag [#allocation6], %s1334_s30  ;;  %s1345_s29 = scalar_lea.vmem [#allocation5], %s961_s4 }
  0x51   : > { %1132 = dma.done.wait (%p1666_p6), %s173_s23, 16384  }
  0x52   : > { %1134 = vsyncadd (%p1666_p6), %s173_s23, 4294950912  ;;  %v204_v0 = vld [vmem:[%s1338_s3] sm:$0xff]  ;;  %v205_v1 = vld [vmem:[%s1338_s3 + $0x8] sm:$0xff]  ;;  %s963_s20 = sshll.u32 %s1334_s30, 3  ;;  %s965_s5 = sshll.u32 %s1196_s13, 7 }
  0x53   : > { %v332_v2 = vld [vmem:[%s1345_s29] sm:$0xff]  ;;  %v333_v3 = vld [vmem:[%s1345_s29 + $0x8] sm:$0xff]  ;;  %v206_v4 = vld [vmem:[%s1338_s3 + $0x10] sm:$0xff]  ;;  %s201_s6 = scalar_lea.vmem [#allocation7], %s963_s20  ;;  %s1612_s24 = scalar_lea.hbm %s1657_s2, %s965_s5 }
  0x54   : > { %v334_v5 = vld [vmem:[%s1345_s29 + $0x10] sm:$0xff]  ;;  %v460_v6 = vsub.f32 %v204_v0, %v332_v2  ;;  %v461_v7 = vsub.f32 %v205_v1, %v333_v3  ;;  %v207_v8 = vld [vmem:[%s1338_s3 + $0x18] sm:$0xff]  ;;  %v208_v11 = vld [vmem:[%s1338_s3 + $0x20] sm:$0xff]  ;;  %s858_s14 = sshll.u32 %s201_s6, 4  ;;  %s845_s26 = scalar_lea.sflag [#allocation4], %s1334_s30  ;;  %s1614_s14 = int_to_ptr.vmem [resolvable:$true] %s858_s14 }
  0x55   : > { %v335_v9 = vld [vmem:[%s1345_s29 + $0x18] sm:$0xff]  ;;  %v462_v10 = vsub.f32 %v206_v4, %v334_v5  ;;  %v336_v12 = vld [vmem:[%s1345_s29 + $0x20] sm:$0xff]  ;;  %v209_v16 = vld [vmem:[%s1338_s3 + $0x28] sm:$0xff]  ;;  %s1083_s27 = scalar_lea.vmem %s1614_s14, 128  ;;  %p1667_p0 = scmp.ne.s32.totalorder %s1662_s21, 0 }
  0x56   : > { %v463_v13 = vsub.f32 %v207_v8, %v335_v9  ;;  %v588_v14 = vmul.f32 %v460_v6, %v460_v6  ;;  %v589_v15 = vmul.f32 %v461_v7, %v461_v7  ;;  %v337_v17 = vld [vmem:[%s1345_s29 + $0x28] sm:$0xff]  ;;  %v464_v18 = vsub.f32 %v208_v11, %v336_v12  ;;  %v210_v20 = vld [vmem:[%s1338_s3 + $0x30] sm:$0xff]  ;;  %v211_v25 = vld [vmem:[%s1338_s3 + $0x38] sm:$0xff]  ;;  %p1084_p12 = scmp.ne.s32.totalorder %s1614_s14, %s1083_s27  ;;  %s1159_s13 = smov [#allocation7]  }
  0x57   : > { %v590_v19 = vmul.f32 %v462_v10, %v462_v10  ;;  %v338_v21 = vld [vmem:[%s1345_s29 + $0x30] sm:$0xff]  ;;  %v465_v22 = vsub.f32 %v209_v16, %v337_v17  ;;  %v339_v26 = vld [vmem:[%s1345_s29 + $0x38] sm:$0xff]  ;;  %v212_v30 = vld [vmem:[%s1338_s3 + $0x40] sm:$0xff]  ;;  %s1087_s25 = sshll.u32 %s1159_s13, 4  ;;  %s1088_s25 = int_to_ptr.vmem [resolvable:$false] %s1087_s25 }
  0x58   : > { %v591_v23 = vmul.f32 %v463_v13, %v463_v13  ;;  %v716_v24 = vadd.f32 %v589_v15, %v588_v14  ;;  %v466_v27 = vsub.f32 %v210_v20, %v338_v21  ;;  %v592_v28 = vmul.f32 %v464_v18, %v464_v18  ;;  %v340_v31 = vld [vmem:[%s1345_s29 + $0x40] sm:$0xff]  ;;  %v213_v35 = vld [vmem:[%s1338_s3 + $0x48] sm:$0xff]  ;;  %v214_v40 = vld [vmem:[%s1338_s3 + $0x50] sm:$0xff]  ;;  %p1085_p2 = pnand %p1084_p12, %p1667_p0  ;;  %s1089_s7 = scalar_lea.vmem %s1088_s25, 256 }
  0x59   : > { %v467_v32 = vsub.f32 %v211_v25, %v339_v26  ;;  %v593_v33 = vmul.f32 %v465_v22, %v465_v22  ;;  %v341_v36 = vld [vmem:[%s1345_s29 + $0x48] sm:$0xff]  ;;  %v468_v37 = vsub.f32 %v212_v30, %v340_v31  ;;  %v342_v41 = vld [vmem:[%s1345_s29 + $0x50] sm:$0xff]  ;;  %v215_v45 = vld [vmem:[%s1338_s3 + $0x58] sm:$0xff]  ;;  %p1090_p4 = scmp.lt.s32.totalorder %s1614_s14, %s1088_s25  ;;  %p1091_p5 = scmp.lt.s32.totalorder %s1089_s7, %s1083_s27 }
  0x5a   : > { %v717_v29 = vadd.f32 %v716_v24, %v590_v19  ;;  %v594_v38 = vmul.f32 %v466_v27, %v466_v27  ;;  %v469_v42 = vsub.f32 %v213_v35, %v341_v36  ;;  %v343_v46 = vld [vmem:[%s1345_s29 + $0x58] sm:$0xff]  ;;  %v470_v47 = vsub.f32 %v214_v40, %v342_v41  ;;  %v216_v50 = vld [vmem:[%s1338_s3 + $0x60] sm:$0xff]  ;;  %v217_v55 = vld [vmem:[%s1338_s3 + $0x68] sm:$0xff]  ;;  %p1086_p9 = pneg %p1085_p2 }
  0x5b   : > { %v595_v43 = vmul.f32 %v467_v32, %v467_v32  ;;  %v596_v48 = vmul.f32 %v468_v37, %v468_v37  ;;  %v344_v51 = vld [vmem:[%s1345_s29 + $0x60] sm:$0xff]  ;;  %v471_v52 = vsub.f32 %v215_v45, %v343_v46  ;;  %v345_v56 = vld [vmem:[%s1345_s29 + $0x68] sm:$0xff]  ;;  %v218_v60 = vld [vmem:[%s1338_s3 + $0x70] sm:$0xff]  ;;  %p1092_p10 = por %p1091_p5, %p1090_p4 }
  0x5c   : > { %v718_v34 = vadd.f32 %v717_v29, %v591_v23  ;;  %v597_v53 = vmul.f32 %v469_v42, %v469_v42  ;;  %v472_v57 = vsub.f32 %v216_v50, %v344_v51  ;;  %v598_v58 = vmul.f32 %v470_v47, %v470_v47  ;;  %v346_v61 = vld [vmem:[%s1345_s29 + $0x70] sm:$0xff]  ;;  %v219_v1 = vld [vmem:[%s1338_s3 + $0x78] sm:$0xff]  ;;  %v220_v6 = vld [vmem:[%s1338_s3 + $0x80] sm:$0xff] }
  0x5d   : > { %v473_v62 = vsub.f32 %v217_v55, %v345_v56  ;;  %v599_v63 = vmul.f32 %v471_v52, %v471_v52  ;;  %v347_v2 = vld [vmem:[%s1345_s29 + $0x78] sm:$0xff]  ;;  %v474_v3 = vsub.f32 %v218_v60, %v346_v61  ;;  %v348_v7 = vld [vmem:[%s1345_s29 + $0x80] sm:$0xff]  ;;  %v221_v11 = vld [vmem:[%s1338_s3 + $0x88] sm:$0xff]  ;;  %p1093_p11 = pnand %p1092_p10, %p1086_p9 }
  0x5e   : > { %v719_v39 = vadd.f32 %v718_v34, %v592_v28  ;;  %v600_v4 = vmul.f32 %v472_v57, %v472_v57  ;;  %v475_v8 = vsub.f32 %v219_v1, %v347_v2  ;;  %v349_v12 = vld [vmem:[%s1345_s29 + $0x88] sm:$0xff]  ;;  %v476_v13 = vsub.f32 %v220_v6, %v348_v7  ;;  %v222_v16 = vld [vmem:[%s1338_s3 + $0x90] sm:$0xff]  ;;  %v223_v21 = vld [vmem:[%s1338_s3 + $0x98] sm:$0xff] }
  0x5f   : > { %v601_v9 = vmul.f32 %v473_v62, %v473_v62  ;;  %v602_v14 = vmul.f32 %v474_v3, %v474_v3  ;;  %v350_v17 = vld [vmem:[%s1345_s29 + $0x90] sm:$0xff]  ;;  %v477_v18 = vsub.f32 %v221_v11, %v349_v12  ;;  %v351_v22 = vld [vmem:[%s1345_s29 + $0x98] sm:$0xff]  ;;  %v224_v26 = vld [vmem:[%s1338_s3 + $0xa0] sm:$0xff] }
  0x60   : > { %v720_v44 = vadd.f32 %v719_v39, %v593_v33  ;;  %v603_v19 = vmul.f32 %v475_v8, %v475_v8  ;;  %v478_v23 = vsub.f32 %v222_v16, %v350_v17  ;;  %v604_v24 = vmul.f32 %v476_v13, %v476_v13  ;;  %v352_v27 = vld [vmem:[%s1345_s29 + $0xa0] sm:$0xff]  ;;  %v225_v31 = vld [vmem:[%s1338_s3 + $0xa8] sm:$0xff]  ;;  %v226_v36 = vld [vmem:[%s1338_s3 + $0xb0] sm:$0xff] }
  0x61   : > { %v479_v28 = vsub.f32 %v223_v21, %v351_v22  ;;  %v605_v29 = vmul.f32 %v477_v18, %v477_v18  ;;  %v353_v32 = vld [vmem:[%s1345_s29 + $0xa8] sm:$0xff]  ;;  %v480_v33 = vsub.f32 %v224_v26, %v352_v27  ;;  %v354_v37 = vld [vmem:[%s1345_s29 + $0xb0] sm:$0xff]  ;;  %v227_v41 = vld [vmem:[%s1338_s3 + $0xb8] sm:$0xff] }
  0x62   : > { %v721_v49 = vadd.f32 %v720_v44, %v594_v38  ;;  %v606_v34 = vmul.f32 %v478_v23, %v478_v23  ;;  %v481_v38 = vsub.f32 %v225_v31, %v353_v32  ;;  %v355_v42 = vld [vmem:[%s1345_s29 + $0xb8] sm:$0xff]  ;;  %v228_v46 = vld [vmem:[%s1338_s3 + $0xc0] sm:$0xff]  ;;  %v229_v51 = vld [vmem:[%s1338_s3 + $0xc8] sm:$0xff] }
  0x63   : > { %v607_v39 = vmul.f32 %v479_v28, %v479_v28  ;;  %v608_v44 = vmul.f32 %v480_v33, %v480_v33  ;;  %v356_v47 = vld [vmem:[%s1345_s29 + $0xc0] sm:$0xff]  ;;  %v357_v52 = vld [vmem:[%s1345_s29 + $0xc8] sm:$0xff]  ;;  %v230_v56 = vld [vmem:[%s1338_s3 + $0xd0] sm:$0xff] }
  0x64   : > { %v722_v54 = vadd.f32 %v721_v49, %v595_v43  ;;  %v482_v43 = vsub.f32 %v226_v36, %v354_v37  ;;  %v609_v49 = vmul.f32 %v481_v38, %v481_v38  ;;  %v358_v57 = vld [vmem:[%s1345_s29 + $0xd0] sm:$0xff]  ;;  %v231_v61 = vld [vmem:[%s1338_s3 + $0xd8] sm:$0xff]  ;;  %v232_v2 = vld [vmem:[%s1338_s3 + $0xe0] sm:$0xff] }
  0x65   : > { %v359_v62 = vld [vmem:[%s1345_s29 + $0xd8] sm:$0xff]  ;;  %v360_v3 = vld [vmem:[%s1345_s29 + $0xe0] sm:$0xff]  ;;  %v233_v7 = vld [vmem:[%s1338_s3 + $0xe8] sm:$0xff] }
  0x66   : > { %v723_v59 = vadd.f32 %v722_v54, %v596_v48  ;;  %v483_v48 = vsub.f32 %v227_v41, %v355_v42  ;;  %v610_v54 = vmul.f32 %v482_v43, %v482_v43  ;;  %v361_v8 = vld [vmem:[%s1345_s29 + $0xe8] sm:$0xff]  ;;  %v234_v12 = vld [vmem:[%s1338_s3 + $0xf0] sm:$0xff]  ;;  %v235_v17 = vld [vmem:[%s1338_s3 + $0xf8] sm:$0xff] }
  0x67   : > { %v362_v13 = vld [vmem:[%s1345_s29 + $0xf0] sm:$0xff]  ;;  %v363_v18 = vld [vmem:[%s1345_s29 + $0xf8] sm:$0xff]  ;;  %v236_v22 = vld [vmem:[%s1338_s3 + $0x100] sm:$0xff] }
  0x68   : > { %v724_v0 = vadd.f32 %v723_v59, %v597_v53  ;;  %v484_v53 = vsub.f32 %v228_v46, %v356_v47  ;;  %v611_v59 = vmul.f32 %v483_v48, %v483_v48  ;;  %v364_v23 = vld [vmem:[%s1345_s29 + $0x100] sm:$0xff]  ;;  %v237_v27 = vld [vmem:[%s1338_s3 + $0x108] sm:$0xff]  ;;  %v238_v32 = vld [vmem:[%s1338_s3 + $0x110] sm:$0xff] }
  0x69   : > { %v365_v28 = vld [vmem:[%s1345_s29 + $0x108] sm:$0xff]  ;;  %v366_v33 = vld [vmem:[%s1345_s29 + $0x110] sm:$0xff]  ;;  %v239_v37 = vld [vmem:[%s1338_s3 + $0x118] sm:$0xff] }
  0x6a   : > { %v725_v5 = vadd.f32 %v724_v0, %v598_v58  ;;  %v485_v58 = vsub.f32 %v229_v51, %v357_v52  ;;  %v612_v0 = vmul.f32 %v484_v53, %v484_v53  ;;  %v367_v38 = vld [vmem:[%s1345_s29 + $0x118] sm:$0xff]  ;;  %v240_v42 = vld [vmem:[%s1338_s3 + $0x120] sm:$0xff]  ;;  %v241_v47 = vld [vmem:[%s1338_s3 + $0x128] sm:$0xff] }
  0x6b   : > { %v368_v43 = vld [vmem:[%s1345_s29 + $0x120] sm:$0xff]  ;;  %v369_v48 = vld [vmem:[%s1345_s29 + $0x128] sm:$0xff]  ;;  %v242_v52 = vld [vmem:[%s1338_s3 + $0x130] sm:$0xff] }
  0x6c   : > { %v726_v10 = vadd.f32 %v725_v5, %v599_v63  ;;  %v486_v63 = vsub.f32 %v230_v56, %v358_v57  ;;  %v613_v5 = vmul.f32 %v485_v58, %v485_v58  ;;  %v370_v53 = vld [vmem:[%s1345_s29 + $0x130] sm:$0xff]  ;;  %v243_v57 = vld [vmem:[%s1338_s3 + $0x138] sm:$0xff] }
  0x6d   : > { %v371_v58 = vld [vmem:[%s1345_s29 + $0x138] sm:$0xff] }
  0x6e   : > { %v727_v15 = vadd.f32 %v726_v10, %v600_v4  ;;  %v487_v4 = vsub.f32 %v231_v61, %v359_v62  ;;  %v614_v10 = vmul.f32 %v486_v63, %v486_v63  ;;  %v244_v62 = vld [vmem:[%s1338_s3 + $0x140] sm:$0xff] }
  0x6f   : > { %v372_v63 = vld [vmem:[%s1345_s29 + $0x140] sm:$0xff] }
  0x70   : > { %v728_v20 = vadd.f32 %v727_v15, %v601_v9  ;;  %v488_v9 = vsub.f32 %v232_v2, %v360_v3  ;;  %v615_v15 = vmul.f32 %v487_v4, %v487_v4  ;;  %v245_v3 = vld [vmem:[%s1338_s3 + $0x148] sm:$0xff] }
  0x71   : > { %v373_v4 = vld [vmem:[%s1345_s29 + $0x148] sm:$0xff] }
  0x72   : > { %v729_v25 = vadd.f32 %v728_v20, %v602_v14  ;;  %v489_v14 = vsub.f32 %v233_v7, %v361_v8  ;;  %v616_v20 = vmul.f32 %v488_v9, %v488_v9  ;;  %v246_v8 = vld [vmem:[%s1338_s3 + $0x150] sm:$0xff] }
  0x73   : > { %v374_v9 = vld [vmem:[%s1345_s29 + $0x150] sm:$0xff] }
  0x74   : > { %v730_v30 = vadd.f32 %v729_v25, %v603_v19  ;;  %v490_v19 = vsub.f32 %v234_v12, %v362_v13  ;;  %v617_v25 = vmul.f32 %v489_v14, %v489_v14  ;;  %v247_v13 = vld [vmem:[%s1338_s3 + $0x158] sm:$0xff] }
  0x75   : > { %v375_v14 = vld [vmem:[%s1345_s29 + $0x158] sm:$0xff] }
  0x76   : > { %v731_v35 = vadd.f32 %v730_v30, %v604_v24  ;;  %v491_v24 = vsub.f32 %v235_v17, %v363_v18  ;;  %v618_v30 = vmul.f32 %v490_v19, %v490_v19  ;;  %v248_v18 = vld [vmem:[%s1338_s3 + $0x160] sm:$0xff] }
  0x77   : > { %v376_v19 = vld [vmem:[%s1345_s29 + $0x160] sm:$0xff] }
  0x78   : > { %v732_v40 = vadd.f32 %v731_v35, %v605_v29  ;;  %v492_v29 = vsub.f32 %v236_v22, %v364_v23  ;;  %v619_v35 = vmul.f32 %v491_v24, %v491_v24  ;;  %v249_v23 = vld [vmem:[%s1338_s3 + $0x168] sm:$0xff] }
  0x79   : > { %v377_v24 = vld [vmem:[%s1345_s29 + $0x168] sm:$0xff] }
  0x7a   : > { %v733_v45 = vadd.f32 %v732_v40, %v606_v34  ;;  %v493_v34 = vsub.f32 %v237_v27, %v365_v28  ;;  %v620_v40 = vmul.f32 %v492_v29, %v492_v29  ;;  %v250_v28 = vld [vmem:[%s1338_s3 + $0x170] sm:$0xff] }
  0x7b   : > { %v378_v29 = vld [vmem:[%s1345_s29 + $0x170] sm:$0xff] }
  0x7c   : > { %v734_v50 = vadd.f32 %v733_v45, %v607_v39  ;;  %v494_v39 = vsub.f32 %v238_v32, %v366_v33  ;;  %v621_v45 = vmul.f32 %v493_v34, %v493_v34  ;;  %v251_v33 = vld [vmem:[%s1338_s3 + $0x178] sm:$0xff] }
  0x7d   : > { %v379_v34 = vld [vmem:[%s1345_s29 + $0x178] sm:$0xff] }
  0x7e   : > { %v735_v55 = vadd.f32 %v734_v50, %v608_v44  ;;  %v495_v44 = vsub.f32 %v239_v37, %v367_v38  ;;  %v622_v50 = vmul.f32 %v494_v39, %v494_v39  ;;  %v252_v38 = vld [vmem:[%s1338_s3 + $0x180] sm:$0xff] }
  0x7f   : > { %v380_v39 = vld [vmem:[%s1345_s29 + $0x180] sm:$0xff] }
  0x80   : > { %v736_v60 = vadd.f32 %v735_v55, %v609_v49  ;;  %v496_v49 = vsub.f32 %v240_v42, %v368_v43  ;;  %v623_v55 = vmul.f32 %v495_v44, %v495_v44  ;;  %v253_v43 = vld [vmem:[%s1338_s3 + $0x188] sm:$0xff] }
  0x81   : > { %v381_v44 = vld [vmem:[%s1345_s29 + $0x188] sm:$0xff] }
  0x82   : > { %v737_v1 = vadd.f32 %v736_v60, %v610_v54  ;;  %v497_v54 = vsub.f32 %v241_v47, %v369_v48  ;;  %v624_v60 = vmul.f32 %v496_v49, %v496_v49  ;;  %v254_v48 = vld [vmem:[%s1338_s3 + $0x190] sm:$0xff] }
  0x83   : > { %v382_v49 = vld [vmem:[%s1345_s29 + $0x190] sm:$0xff] }
  0x84   : > { %v738_v6 = vadd.f32 %v737_v1, %v611_v59  ;;  %v498_v59 = vsub.f32 %v242_v52, %v370_v53  ;;  %v625_v1 = vmul.f32 %v497_v54, %v497_v54  ;;  %v255_v53 = vld [vmem:[%s1338_s3 + $0x198] sm:$0xff] }
  0x85   : > { %v383_v54 = vld [vmem:[%s1345_s29 + $0x198] sm:$0xff] }
  0x86   : > { %v739_v11 = vadd.f32 %v738_v6, %v612_v0  ;;  %v499_v0 = vsub.f32 %v243_v57, %v371_v58  ;;  %v626_v6 = vmul.f32 %v498_v59, %v498_v59  ;;  %v256_v58 = vld [vmem:[%s1338_s3 + $0x1a0] sm:$0xff] }
  0x87   : > { %v384_v59 = vld [vmem:[%s1345_s29 + $0x1a0] sm:$0xff] }
  0x88   : > { %v740_v16 = vadd.f32 %v739_v11, %v613_v5  ;;  %v500_v5 = vsub.f32 %v244_v62, %v372_v63  ;;  %v627_v11 = vmul.f32 %v499_v0, %v499_v0  ;;  %v257_v63 = vld [vmem:[%s1338_s3 + $0x1a8] sm:$0xff] }
  0x89   : > { %v385_v0 = vld [vmem:[%s1345_s29 + $0x1a8] sm:$0xff] }
  0x8a   : > { %v741_v21 = vadd.f32 %v740_v16, %v614_v10  ;;  %v501_v10 = vsub.f32 %v245_v3, %v373_v4  ;;  %v628_v16 = vmul.f32 %v500_v5, %v500_v5  ;;  %v258_v4 = vld [vmem:[%s1338_s3 + $0x1b0] sm:$0xff] }
  0x8b   : > { %v386_v5 = vld [vmem:[%s1345_s29 + $0x1b0] sm:$0xff] }
  0x8c   : > { %v742_v26 = vadd.f32 %v741_v21, %v615_v15  ;;  %v502_v15 = vsub.f32 %v246_v8, %v374_v9  ;;  %v629_v21 = vmul.f32 %v501_v10, %v501_v10  ;;  %v259_v9 = vld [vmem:[%s1338_s3 + $0x1b8] sm:$0xff] }
  0x8d   : > { %v387_v10 = vld [vmem:[%s1345_s29 + $0x1b8] sm:$0xff] }
  0x8e   : > { %v743_v31 = vadd.f32 %v742_v26, %v616_v20  ;;  %v503_v20 = vsub.f32 %v247_v13, %v375_v14  ;;  %v630_v26 = vmul.f32 %v502_v15, %v502_v15  ;;  %v260_v14 = vld [vmem:[%s1338_s3 + $0x1c0] sm:$0xff] }
  0x8f   : > { %v388_v15 = vld [vmem:[%s1345_s29 + $0x1c0] sm:$0xff] }
  0x90   : > { %v744_v36 = vadd.f32 %v743_v31, %v617_v25  ;;  %v504_v25 = vsub.f32 %v248_v18, %v376_v19  ;;  %v631_v31 = vmul.f32 %v503_v20, %v503_v20  ;;  %v261_v19 = vld [vmem:[%s1338_s3 + $0x1c8] sm:$0xff] }
  0x91   : > { %v389_v20 = vld [vmem:[%s1345_s29 + $0x1c8] sm:$0xff] }
  0x92   : > { %v745_v41 = vadd.f32 %v744_v36, %v618_v30  ;;  %v505_v30 = vsub.f32 %v249_v23, %v377_v24  ;;  %v632_v36 = vmul.f32 %v504_v25, %v504_v25  ;;  %v262_v24 = vld [vmem:[%s1338_s3 + $0x1d0] sm:$0xff] }
  0x93   : > { %v390_v25 = vld [vmem:[%s1345_s29 + $0x1d0] sm:$0xff] }
  0x94   : > { %v746_v46 = vadd.f32 %v745_v41, %v619_v35  ;;  %v506_v35 = vsub.f32 %v250_v28, %v378_v29  ;;  %v633_v41 = vmul.f32 %v505_v30, %v505_v30  ;;  %v263_v29 = vld [vmem:[%s1338_s3 + $0x1d8] sm:$0xff] }
  0x95   : > { %v391_v30 = vld [vmem:[%s1345_s29 + $0x1d8] sm:$0xff] }
  0x96   : > { %v747_v51 = vadd.f32 %v746_v46, %v620_v40  ;;  %v507_v40 = vsub.f32 %v251_v33, %v379_v34  ;;  %v634_v46 = vmul.f32 %v506_v35, %v506_v35  ;;  %v264_v34 = vld [vmem:[%s1338_s3 + $0x1e0] sm:$0xff] }
  0x97   : > { %v392_v35 = vld [vmem:[%s1345_s29 + $0x1e0] sm:$0xff] }
  0x98   : > { %v748_v56 = vadd.f32 %v747_v51, %v621_v45  ;;  %v508_v45 = vsub.f32 %v252_v38, %v380_v39  ;;  %v635_v51 = vmul.f32 %v507_v40, %v507_v40  ;;  %v265_v39 = vld [vmem:[%s1338_s3 + $0x1e8] sm:$0xff] }
  0x99   : > { %v393_v40 = vld [vmem:[%s1345_s29 + $0x1e8] sm:$0xff] }
  0x9a   : > { %v749_v61 = vadd.f32 %v748_v56, %v622_v50  ;;  %v509_v50 = vsub.f32 %v253_v43, %v381_v44  ;;  %v636_v56 = vmul.f32 %v508_v45, %v508_v45  ;;  %v266_v44 = vld [vmem:[%s1338_s3 + $0x1f0] sm:$0xff] }
  0x9b   : > { %v394_v45 = vld [vmem:[%s1345_s29 + $0x1f0] sm:$0xff] }
  0x9c   : > { %v750_v2 = vadd.f32 %v749_v61, %v623_v55  ;;  %v510_v55 = vsub.f32 %v254_v48, %v382_v49  ;;  %v637_v61 = vmul.f32 %v509_v50, %v509_v50  ;;  %v267_v49 = vld [vmem:[%s1338_s3 + $0x1f8] sm:$0xff] }
  0x9d   : > { %v395_v50 = vld [vmem:[%s1345_s29 + $0x1f8] sm:$0xff] }
  0x9e   : > { %v751_v7 = vadd.f32 %v750_v2, %v624_v60  ;;  %v511_v60 = vsub.f32 %v255_v53, %v383_v54  ;;  %v638_v2 = vmul.f32 %v510_v55, %v510_v55  ;;  %v268_v54 = vld [vmem:[%s1338_s3 + $0x200] sm:$0xff] }
  0x9f   : > { %v396_v55 = vld [vmem:[%s1345_s29 + $0x200] sm:$0xff] }
  0xa0   : > { %v752_v12 = vadd.f32 %v751_v7, %v625_v1  ;;  %v512_v1 = vsub.f32 %v256_v58, %v384_v59  ;;  %v639_v7 = vmul.f32 %v511_v60, %v511_v60  ;;  %v269_v59 = vld [vmem:[%s1338_s3 + $0x208] sm:$0xff] }
  0xa1   : > { %v397_v60 = vld [vmem:[%s1345_s29 + $0x208] sm:$0xff] }
  0xa2   : > { %v753_v17 = vadd.f32 %v752_v12, %v626_v6  ;;  %v513_v6 = vsub.f32 %v257_v63, %v385_v0  ;;  %v640_v12 = vmul.f32 %v512_v1, %v512_v1  ;;  %v270_v0 = vld [vmem:[%s1338_s3 + $0x210] sm:$0xff] }
  0xa3   : > { %v398_v1 = vld [vmem:[%s1345_s29 + $0x210] sm:$0xff] }
  0xa4   : > { %v754_v22 = vadd.f32 %v753_v17, %v627_v11  ;;  %v514_v11 = vsub.f32 %v258_v4, %v386_v5  ;;  %v641_v17 = vmul.f32 %v513_v6, %v513_v6  ;;  %v271_v5 = vld [vmem:[%s1338_s3 + $0x218] sm:$0xff] }
  0xa5   : > { %v399_v6 = vld [vmem:[%s1345_s29 + $0x218] sm:$0xff] }
  0xa6   : > { %v755_v27 = vadd.f32 %v754_v22, %v628_v16  ;;  %v515_v16 = vsub.f32 %v259_v9, %v387_v10  ;;  %v642_v22 = vmul.f32 %v514_v11, %v514_v11  ;;  %v272_v10 = vld [vmem:[%s1338_s3 + $0x220] sm:$0xff] }
  0xa7   : > { %v400_v11 = vld [vmem:[%s1345_s29 + $0x220] sm:$0xff] }
  0xa8   : > { %v756_v32 = vadd.f32 %v755_v27, %v629_v21  ;;  %v516_v21 = vsub.f32 %v260_v14, %v388_v15  ;;  %v643_v27 = vmul.f32 %v515_v16, %v515_v16  ;;  %v273_v15 = vld [vmem:[%s1338_s3 + $0x228] sm:$0xff] }
  0xa9   : > { %v401_v16 = vld [vmem:[%s1345_s29 + $0x228] sm:$0xff] }
  0xaa   : > { %v757_v37 = vadd.f32 %v756_v32, %v630_v26  ;;  %v517_v26 = vsub.f32 %v261_v19, %v389_v20  ;;  %v644_v32 = vmul.f32 %v516_v21, %v516_v21  ;;  %v274_v20 = vld [vmem:[%s1338_s3 + $0x230] sm:$0xff] }
  0xab   : > { %v402_v21 = vld [vmem:[%s1345_s29 + $0x230] sm:$0xff] }
  0xac   : > { %v758_v42 = vadd.f32 %v757_v37, %v631_v31  ;;  %v518_v31 = vsub.f32 %v262_v24, %v390_v25  ;;  %v645_v37 = vmul.f32 %v517_v26, %v517_v26  ;;  %v275_v25 = vld [vmem:[%s1338_s3 + $0x238] sm:$0xff] }
  0xad   : > { %v403_v26 = vld [vmem:[%s1345_s29 + $0x238] sm:$0xff] }
  0xae   : > { %v759_v47 = vadd.f32 %v758_v42, %v632_v36  ;;  %v519_v36 = vsub.f32 %v263_v29, %v391_v30  ;;  %v646_v42 = vmul.f32 %v518_v31, %v518_v31  ;;  %v276_v30 = vld [vmem:[%s1338_s3 + $0x240] sm:$0xff] }
  0xaf   : > { %v404_v31 = vld [vmem:[%s1345_s29 + $0x240] sm:$0xff] }
  0xb0   : > { %v760_v52 = vadd.f32 %v759_v47, %v633_v41  ;;  %v520_v41 = vsub.f32 %v264_v34, %v392_v35  ;;  %v647_v47 = vmul.f32 %v519_v36, %v519_v36  ;;  %v277_v35 = vld [vmem:[%s1338_s3 + $0x248] sm:$0xff] }
  0xb1   : > { %v405_v36 = vld [vmem:[%s1345_s29 + $0x248] sm:$0xff] }
  0xb2   : > { %v761_v57 = vadd.f32 %v760_v52, %v634_v46  ;;  %v521_v46 = vsub.f32 %v265_v39, %v393_v40  ;;  %v648_v52 = vmul.f32 %v520_v41, %v520_v41  ;;  %v278_v40 = vld [vmem:[%s1338_s3 + $0x250] sm:$0xff] }
  0xb3   : > { %v406_v41 = vld [vmem:[%s1345_s29 + $0x250] sm:$0xff] }
  0xb4   : > { %v762_v62 = vadd.f32 %v761_v57, %v635_v51  ;;  %v522_v51 = vsub.f32 %v266_v44, %v394_v45  ;;  %v649_v57 = vmul.f32 %v521_v46, %v521_v46  ;;  %v279_v45 = vld [vmem:[%s1338_s3 + $0x258] sm:$0xff] }
  0xb5   : > { %v407_v46 = vld [vmem:[%s1345_s29 + $0x258] sm:$0xff] }
  0xb6   : > { %v763_v3 = vadd.f32 %v762_v62, %v636_v56  ;;  %v523_v56 = vsub.f32 %v267_v49, %v395_v50  ;;  %v650_v62 = vmul.f32 %v522_v51, %v522_v51  ;;  %v280_v50 = vld [vmem:[%s1338_s3 + $0x260] sm:$0xff] }
  0xb7   : > { %v408_v51 = vld [vmem:[%s1345_s29 + $0x260] sm:$0xff] }
  0xb8   : > { %v764_v8 = vadd.f32 %v763_v3, %v637_v61  ;;  %v524_v61 = vsub.f32 %v268_v54, %v396_v55  ;;  %v651_v3 = vmul.f32 %v523_v56, %v523_v56  ;;  %v281_v55 = vld [vmem:[%s1338_s3 + $0x268] sm:$0xff] }
  0xb9   : > { %v409_v56 = vld [vmem:[%s1345_s29 + $0x268] sm:$0xff] }
  0xba   : > { %v765_v13 = vadd.f32 %v764_v8, %v638_v2  ;;  %v525_v2 = vsub.f32 %v269_v59, %v397_v60  ;;  %v652_v8 = vmul.f32 %v524_v61, %v524_v61  ;;  %v282_v60 = vld [vmem:[%s1338_s3 + $0x270] sm:$0xff] }
  0xbb   : > { %v410_v61 = vld [vmem:[%s1345_s29 + $0x270] sm:$0xff] }
  0xbc   : > { %v766_v18 = vadd.f32 %v765_v13, %v639_v7  ;;  %v526_v7 = vsub.f32 %v270_v0, %v398_v1  ;;  %v653_v13 = vmul.f32 %v525_v2, %v525_v2  ;;  %v283_v1 = vld [vmem:[%s1338_s3 + $0x278] sm:$0xff] }
  0xbd   : > { %v411_v2 = vld [vmem:[%s1345_s29 + $0x278] sm:$0xff] }
  0xbe   : > { %v767_v23 = vadd.f32 %v766_v18, %v640_v12  ;;  %v527_v12 = vsub.f32 %v271_v5, %v399_v6  ;;  %v654_v18 = vmul.f32 %v526_v7, %v526_v7  ;;  %v284_v6 = vld [vmem:[%s1338_s3 + $0x280] sm:$0xff] }
  0xbf   : > { %v412_v7 = vld [vmem:[%s1345_s29 + $0x280] sm:$0xff] }
  0xc0   : > { %v768_v28 = vadd.f32 %v767_v23, %v641_v17  ;;  %v528_v17 = vsub.f32 %v272_v10, %v400_v11  ;;  %v655_v23 = vmul.f32 %v527_v12, %v527_v12  ;;  %v285_v11 = vld [vmem:[%s1338_s3 + $0x288] sm:$0xff] }
  0xc1   : > { %v413_v12 = vld [vmem:[%s1345_s29 + $0x288] sm:$0xff] }
  0xc2   : > { %v769_v33 = vadd.f32 %v768_v28, %v642_v22  ;;  %v529_v22 = vsub.f32 %v273_v15, %v401_v16  ;;  %v656_v28 = vmul.f32 %v528_v17, %v528_v17  ;;  %v286_v16 = vld [vmem:[%s1338_s3 + $0x290] sm:$0xff] }
  0xc3   : > { %v414_v17 = vld [vmem:[%s1345_s29 + $0x290] sm:$0xff] }
  0xc4   : > { %v770_v38 = vadd.f32 %v769_v33, %v643_v27  ;;  %v530_v27 = vsub.f32 %v274_v20, %v402_v21  ;;  %v657_v33 = vmul.f32 %v529_v22, %v529_v22  ;;  %v287_v21 = vld [vmem:[%s1338_s3 + $0x298] sm:$0xff] }
  0xc5   : > { %v415_v22 = vld [vmem:[%s1345_s29 + $0x298] sm:$0xff] }
  0xc6   : > { %v771_v43 = vadd.f32 %v770_v38, %v644_v32  ;;  %v531_v32 = vsub.f32 %v275_v25, %v403_v26  ;;  %v658_v38 = vmul.f32 %v530_v27, %v530_v27  ;;  %v288_v26 = vld [vmem:[%s1338_s3 + $0x2a0] sm:$0xff] }
  0xc7   : > { %v416_v27 = vld [vmem:[%s1345_s29 + $0x2a0] sm:$0xff] }
  0xc8   : > { %v772_v48 = vadd.f32 %v771_v43, %v645_v37  ;;  %v532_v37 = vsub.f32 %v276_v30, %v404_v31  ;;  %v659_v43 = vmul.f32 %v531_v32, %v531_v32  ;;  %v289_v31 = vld [vmem:[%s1338_s3 + $0x2a8] sm:$0xff] }
  0xc9   : > { %v417_v32 = vld [vmem:[%s1345_s29 + $0x2a8] sm:$0xff] }
  0xca   : > { %v773_v53 = vadd.f32 %v772_v48, %v646_v42  ;;  %v533_v42 = vsub.f32 %v277_v35, %v405_v36  ;;  %v660_v48 = vmul.f32 %v532_v37, %v532_v37  ;;  %v290_v36 = vld [vmem:[%s1338_s3 + $0x2b0] sm:$0xff] }
  0xcb   : > { %v418_v37 = vld [vmem:[%s1345_s29 + $0x2b0] sm:$0xff] }
  0xcc   : > { %v774_v58 = vadd.f32 %v773_v53, %v647_v47  ;;  %v534_v47 = vsub.f32 %v278_v40, %v406_v41  ;;  %v661_v53 = vmul.f32 %v533_v42, %v533_v42  ;;  %v291_v41 = vld [vmem:[%s1338_s3 + $0x2b8] sm:$0xff] }
  0xcd   : > { %v419_v42 = vld [vmem:[%s1345_s29 + $0x2b8] sm:$0xff] }
  0xce   : > { %v775_v63 = vadd.f32 %v774_v58, %v648_v52  ;;  %v535_v52 = vsub.f32 %v279_v45, %v407_v46  ;;  %v662_v58 = vmul.f32 %v534_v47, %v534_v47  ;;  %v292_v46 = vld [vmem:[%s1338_s3 + $0x2c0] sm:$0xff] }
  0xcf   : > { %v420_v47 = vld [vmem:[%s1345_s29 + $0x2c0] sm:$0xff] }
  0xd0   : > { %v776_v4 = vadd.f32 %v775_v63, %v649_v57  ;;  %v536_v57 = vsub.f32 %v280_v50, %v408_v51  ;;  %v663_v63 = vmul.f32 %v535_v52, %v535_v52  ;;  %v293_v51 = vld [vmem:[%s1338_s3 + $0x2c8] sm:$0xff] }
  0xd1   : > { %v421_v52 = vld [vmem:[%s1345_s29 + $0x2c8] sm:$0xff] }
  0xd2   : > { %v777_v9 = vadd.f32 %v776_v4, %v650_v62  ;;  %v537_v62 = vsub.f32 %v281_v55, %v409_v56  ;;  %v664_v4 = vmul.f32 %v536_v57, %v536_v57  ;;  %v294_v56 = vld [vmem:[%s1338_s3 + $0x2d0] sm:$0xff] }
  0xd3   : > { %v422_v57 = vld [vmem:[%s1345_s29 + $0x2d0] sm:$0xff] }
  0xd4   : > { %v778_v14 = vadd.f32 %v777_v9, %v651_v3  ;;  %v538_v3 = vsub.f32 %v282_v60, %v410_v61  ;;  %v665_v9 = vmul.f32 %v537_v62, %v537_v62  ;;  %v295_v61 = vld [vmem:[%s1338_s3 + $0x2d8] sm:$0xff] }
  0xd5   : > { %v423_v62 = vld [vmem:[%s1345_s29 + $0x2d8] sm:$0xff] }
  0xd6   : > { %v779_v19 = vadd.f32 %v778_v14, %v652_v8  ;;  %v539_v8 = vsub.f32 %v283_v1, %v411_v2  ;;  %v666_v14 = vmul.f32 %v538_v3, %v538_v3  ;;  %v296_v2 = vld [vmem:[%s1338_s3 + $0x2e0] sm:$0xff] }
  0xd7   : > { %v424_v3 = vld [vmem:[%s1345_s29 + $0x2e0] sm:$0xff] }
  0xd8   : > { %v780_v24 = vadd.f32 %v779_v19, %v653_v13  ;;  %v540_v13 = vsub.f32 %v284_v6, %v412_v7  ;;  %v667_v19 = vmul.f32 %v539_v8, %v539_v8  ;;  %v297_v7 = vld [vmem:[%s1338_s3 + $0x2e8] sm:$0xff] }
  0xd9   : > { %v425_v8 = vld [vmem:[%s1345_s29 + $0x2e8] sm:$0xff] }
  0xda   : > { %v781_v29 = vadd.f32 %v780_v24, %v654_v18  ;;  %v541_v18 = vsub.f32 %v285_v11, %v413_v12  ;;  %v668_v24 = vmul.f32 %v540_v13, %v540_v13  ;;  %v298_v12 = vld [vmem:[%s1338_s3 + $0x2f0] sm:$0xff] }
  0xdb   : > { %v426_v13 = vld [vmem:[%s1345_s29 + $0x2f0] sm:$0xff] }
  0xdc   : > { %v782_v34 = vadd.f32 %v781_v29, %v655_v23  ;;  %v542_v23 = vsub.f32 %v286_v16, %v414_v17  ;;  %v669_v29 = vmul.f32 %v541_v18, %v541_v18  ;;  %v299_v17 = vld [vmem:[%s1338_s3 + $0x2f8] sm:$0xff] }
  0xdd   : > { %v427_v18 = vld [vmem:[%s1345_s29 + $0x2f8] sm:$0xff] }
  0xde   : > { %v783_v39 = vadd.f32 %v782_v34, %v656_v28  ;;  %v543_v28 = vsub.f32 %v287_v21, %v415_v22  ;;  %v670_v34 = vmul.f32 %v542_v23, %v542_v23  ;;  %v300_v22 = vld [vmem:[%s1338_s3 + $0x300] sm:$0xff] }
  0xdf   : > { %v428_v23 = vld [vmem:[%s1345_s29 + $0x300] sm:$0xff] }
  0xe0   : > { %v784_v44 = vadd.f32 %v783_v39, %v657_v33  ;;  %v544_v33 = vsub.f32 %v288_v26, %v416_v27  ;;  %v671_v39 = vmul.f32 %v543_v28, %v543_v28  ;;  %v301_v27 = vld [vmem:[%s1338_s3 + $0x308] sm:$0xff] }
  0xe1   : > { %v429_v28 = vld [vmem:[%s1345_s29 + $0x308] sm:$0xff] }
  0xe2   : > { %v785_v49 = vadd.f32 %v784_v44, %v658_v38  ;;  %v545_v38 = vsub.f32 %v289_v31, %v417_v32  ;;  %v672_v44 = vmul.f32 %v544_v33, %v544_v33  ;;  %v302_v32 = vld [vmem:[%s1338_s3 + $0x310] sm:$0xff] }
  0xe3   : > { %v430_v33 = vld [vmem:[%s1345_s29 + $0x310] sm:$0xff] }
  0xe4   : > { %v786_v54 = vadd.f32 %v785_v49, %v659_v43  ;;  %v546_v43 = vsub.f32 %v290_v36, %v418_v37  ;;  %v673_v49 = vmul.f32 %v545_v38, %v545_v38  ;;  %v303_v37 = vld [vmem:[%s1338_s3 + $0x318] sm:$0xff] }
  0xe5   : > { %v431_v38 = vld [vmem:[%s1345_s29 + $0x318] sm:$0xff] }
  0xe6   : > { %v787_v59 = vadd.f32 %v786_v54, %v660_v48  ;;  %v547_v48 = vsub.f32 %v291_v41, %v419_v42  ;;  %v674_v54 = vmul.f32 %v546_v43, %v546_v43  ;;  %v304_v42 = vld [vmem:[%s1338_s3 + $0x320] sm:$0xff] }
  0xe7   : > { %v432_v43 = vld [vmem:[%s1345_s29 + $0x320] sm:$0xff] }
  0xe8   : > { %v788_v0 = vadd.f32 %v787_v59, %v661_v53  ;;  %v548_v53 = vsub.f32 %v292_v46, %v420_v47  ;;  %v675_v59 = vmul.f32 %v547_v48, %v547_v48  ;;  %v305_v47 = vld [vmem:[%s1338_s3 + $0x328] sm:$0xff] }
  0xe9   : > { %v433_v48 = vld [vmem:[%s1345_s29 + $0x328] sm:$0xff] }
  0xea   : > { %v789_v5 = vadd.f32 %v788_v0, %v662_v58  ;;  %v549_v58 = vsub.f32 %v293_v51, %v421_v52  ;;  %v676_v0 = vmul.f32 %v548_v53, %v548_v53  ;;  %v306_v52 = vld [vmem:[%s1338_s3 + $0x330] sm:$0xff] }
  0xeb   : > { %v434_v53 = vld [vmem:[%s1345_s29 + $0x330] sm:$0xff] }
  0xec   : > { %v790_v10 = vadd.f32 %v789_v5, %v663_v63  ;;  %v550_v63 = vsub.f32 %v294_v56, %v422_v57  ;;  %v677_v5 = vmul.f32 %v549_v58, %v549_v58  ;;  %v307_v57 = vld [vmem:[%s1338_s3 + $0x338] sm:$0xff] }
  0xed   : > { %v435_v58 = vld [vmem:[%s1345_s29 + $0x338] sm:$0xff] }
  0xee   : > { %v791_v15 = vadd.f32 %v790_v10, %v664_v4  ;;  %v551_v4 = vsub.f32 %v295_v61, %v423_v62  ;;  %v678_v10 = vmul.f32 %v550_v63, %v550_v63  ;;  %v308_v62 = vld [vmem:[%s1338_s3 + $0x340] sm:$0xff] }
  0xef   : > { %v436_v63 = vld [vmem:[%s1345_s29 + $0x340] sm:$0xff] }
  0xf0   : > { %v792_v20 = vadd.f32 %v791_v15, %v665_v9  ;;  %v552_v9 = vsub.f32 %v296_v2, %v424_v3  ;;  %v679_v15 = vmul.f32 %v551_v4, %v551_v4  ;;  %v309_v3 = vld [vmem:[%s1338_s3 + $0x348] sm:$0xff] }
  0xf1   : > { %v437_v4 = vld [vmem:[%s1345_s29 + $0x348] sm:$0xff] }
  0xf2   : > { %v793_v25 = vadd.f32 %v792_v20, %v666_v14  ;;  %v553_v14 = vsub.f32 %v297_v7, %v425_v8  ;;  %v680_v20 = vmul.f32 %v552_v9, %v552_v9  ;;  %v310_v8 = vld [vmem:[%s1338_s3 + $0x350] sm:$0xff] }
  0xf3   : > { %v438_v9 = vld [vmem:[%s1345_s29 + $0x350] sm:$0xff] }
  0xf4   : > { %v794_v30 = vadd.f32 %v793_v25, %v667_v19  ;;  %v554_v19 = vsub.f32 %v298_v12, %v426_v13  ;;  %v681_v25 = vmul.f32 %v553_v14, %v553_v14  ;;  %v311_v13 = vld [vmem:[%s1338_s3 + $0x358] sm:$0xff] }
  0xf5   : > { %v439_v14 = vld [vmem:[%s1345_s29 + $0x358] sm:$0xff] }
  0xf6   : > { %v795_v35 = vadd.f32 %v794_v30, %v668_v24  ;;  %v555_v24 = vsub.f32 %v299_v17, %v427_v18  ;;  %v682_v30 = vmul.f32 %v554_v19, %v554_v19  ;;  %v312_v18 = vld [vmem:[%s1338_s3 + $0x360] sm:$0xff] }
  0xf7   : > { %v440_v19 = vld [vmem:[%s1345_s29 + $0x360] sm:$0xff] }
  0xf8   : > { %v796_v40 = vadd.f32 %v795_v35, %v669_v29  ;;  %v556_v29 = vsub.f32 %v300_v22, %v428_v23  ;;  %v683_v35 = vmul.f32 %v555_v24, %v555_v24  ;;  %v313_v23 = vld [vmem:[%s1338_s3 + $0x368] sm:$0xff] }
  0xf9   : > { %v441_v24 = vld [vmem:[%s1345_s29 + $0x368] sm:$0xff] }
  0xfa   : > { %v797_v45 = vadd.f32 %v796_v40, %v670_v34  ;;  %v557_v34 = vsub.f32 %v301_v27, %v429_v28  ;;  %v684_v40 = vmul.f32 %v556_v29, %v556_v29  ;;  %v314_v28 = vld [vmem:[%s1338_s3 + $0x370] sm:$0xff] }
  0xfb   : > { %v442_v29 = vld [vmem:[%s1345_s29 + $0x370] sm:$0xff] }
  0xfc   : > { %v798_v50 = vadd.f32 %v797_v45, %v671_v39  ;;  %v558_v39 = vsub.f32 %v302_v32, %v430_v33  ;;  %v685_v45 = vmul.f32 %v557_v34, %v557_v34  ;;  %v315_v33 = vld [vmem:[%s1338_s3 + $0x378] sm:$0xff] }
  0xfd   : > { %v443_v34 = vld [vmem:[%s1345_s29 + $0x378] sm:$0xff] }
  0xfe   : > { %v799_v55 = vadd.f32 %v798_v50, %v672_v44  ;;  %v559_v44 = vsub.f32 %v303_v37, %v431_v38  ;;  %v686_v50 = vmul.f32 %v558_v39, %v558_v39  ;;  %v316_v38 = vld [vmem:[%s1338_s3 + $0x380] sm:$0xff] }
  0xff   : > { %v444_v39 = vld [vmem:[%s1345_s29 + $0x380] sm:$0xff] }
 0x100   : > { %v800_v60 = vadd.f32 %v799_v55, %v673_v49  ;;  %v560_v49 = vsub.f32 %v304_v42, %v432_v43  ;;  %v687_v55 = vmul.f32 %v559_v44, %v559_v44  ;;  %v317_v43 = vld [vmem:[%s1338_s3 + $0x388] sm:$0xff] }
 0x101   : > { %v445_v44 = vld [vmem:[%s1345_s29 + $0x388] sm:$0xff] }
 0x102   : > { %v801_v1 = vadd.f32 %v800_v60, %v674_v54  ;;  %v561_v54 = vsub.f32 %v305_v47, %v433_v48  ;;  %v688_v60 = vmul.f32 %v560_v49, %v560_v49  ;;  %v318_v48 = vld [vmem:[%s1338_s3 + $0x390] sm:$0xff] }
 0x103   : > { %v446_v49 = vld [vmem:[%s1345_s29 + $0x390] sm:$0xff] }
 0x104   : > { %v802_v6 = vadd.f32 %v801_v1, %v675_v59  ;;  %v562_v59 = vsub.f32 %v306_v52, %v434_v53  ;;  %v689_v1 = vmul.f32 %v561_v54, %v561_v54  ;;  %v319_v53 = vld [vmem:[%s1338_s3 + $0x398] sm:$0xff] }
 0x105   : > { %v447_v54 = vld [vmem:[%s1345_s29 + $0x398] sm:$0xff] }
 0x106   : > { %v803_v11 = vadd.f32 %v802_v6, %v676_v0  ;;  %v563_v0 = vsub.f32 %v307_v57, %v435_v58  ;;  %v690_v6 = vmul.f32 %v562_v59, %v562_v59  ;;  %v320_v58 = vld [vmem:[%s1338_s3 + $0x3a0] sm:$0xff] }
 0x107   : > { %v448_v59 = vld [vmem:[%s1345_s29 + $0x3a0] sm:$0xff] }
 0x108   : > { %v804_v16 = vadd.f32 %v803_v11, %v677_v5  ;;  %v564_v5 = vsub.f32 %v308_v62, %v436_v63  ;;  %v691_v11 = vmul.f32 %v563_v0, %v563_v0  ;;  %v321_v63 = vld [vmem:[%s1338_s3 + $0x3a8] sm:$0xff] }
 0x109   : > { %v449_v0 = vld [vmem:[%s1345_s29 + $0x3a8] sm:$0xff] }
 0x10a   : > { %v805_v21 = vadd.f32 %v804_v16, %v678_v10  ;;  %v565_v10 = vsub.f32 %v309_v3, %v437_v4  ;;  %v692_v16 = vmul.f32 %v564_v5, %v564_v5  ;;  %v322_v4 = vld [vmem:[%s1338_s3 + $0x3b0] sm:$0xff] }
 0x10b   : > { %v450_v5 = vld [vmem:[%s1345_s29 + $0x3b0] sm:$0xff] }
 0x10c   : > { %v806_v26 = vadd.f32 %v805_v21, %v679_v15  ;;  %v566_v15 = vsub.f32 %v310_v8, %v438_v9  ;;  %v693_v21 = vmul.f32 %v565_v10, %v565_v10  ;;  %v323_v9 = vld [vmem:[%s1338_s3 + $0x3b8] sm:$0xff] }
 0x10d   : > { %v451_v10 = vld [vmem:[%s1345_s29 + $0x3b8] sm:$0xff] }
 0x10e   : > { %v807_v31 = vadd.f32 %v806_v26, %v680_v20  ;;  %v567_v20 = vsub.f32 %v311_v13, %v439_v14  ;;  %v694_v26 = vmul.f32 %v566_v15, %v566_v15  ;;  %v324_v14 = vld [vmem:[%s1338_s3 + $0x3c0] sm:$0xff] }
 0x10f   : > { %v452_v15 = vld [vmem:[%s1345_s29 + $0x3c0] sm:$0xff] }
 0x110   : > { %v808_v36 = vadd.f32 %v807_v31, %v681_v25  ;;  %v568_v25 = vsub.f32 %v312_v18, %v440_v19  ;;  %v695_v31 = vmul.f32 %v567_v20, %v567_v20  ;;  %v325_v19 = vld [vmem:[%s1338_s3 + $0x3c8] sm:$0xff] }
 0x111   : > { %v453_v20 = vld [vmem:[%s1345_s29 + $0x3c8] sm:$0xff] }
 0x112   : > { %v809_v41 = vadd.f32 %v808_v36, %v682_v30  ;;  %v569_v30 = vsub.f32 %v313_v23, %v441_v24  ;;  %v696_v36 = vmul.f32 %v568_v25, %v568_v25  ;;  %v326_v24 = vld [vmem:[%s1338_s3 + $0x3d0] sm:$0xff] }
 0x113   : > { %v454_v25 = vld [vmem:[%s1345_s29 + $0x3d0] sm:$0xff] }
 0x114   : > { %v810_v46 = vadd.f32 %v809_v41, %v683_v35  ;;  %v570_v35 = vsub.f32 %v314_v28, %v442_v29  ;;  %v697_v41 = vmul.f32 %v569_v30, %v569_v30  ;;  %v327_v29 = vld [vmem:[%s1338_s3 + $0x3d8] sm:$0xff] }
 0x115   : > { %v455_v30 = vld [vmem:[%s1345_s29 + $0x3d8] sm:$0xff] }
 0x116   : > { %v811_v51 = vadd.f32 %v810_v46, %v684_v40  ;;  %v571_v40 = vsub.f32 %v315_v33, %v443_v34  ;;  %v698_v46 = vmul.f32 %v570_v35, %v570_v35  ;;  %v328_v34 = vld [vmem:[%s1338_s3 + $0x3e0] sm:$0xff] }
 0x117   : > { %v456_v35 = vld [vmem:[%s1345_s29 + $0x3e0] sm:$0xff] }
 0x118   : > { %v812_v56 = vadd.f32 %v811_v51, %v685_v45  ;;  %v572_v45 = vsub.f32 %v316_v38, %v444_v39  ;;  %v699_v51 = vmul.f32 %v571_v40, %v571_v40  ;;  %v329_v39 = vld [vmem:[%s1338_s3 + $0x3e8] sm:$0xff] }
 0x119   : > { %v457_v40 = vld [vmem:[%s1345_s29 + $0x3e8] sm:$0xff] }
 0x11a   : > { %v813_v61 = vadd.f32 %v812_v56, %v686_v50  ;;  %v573_v50 = vsub.f32 %v317_v43, %v445_v44  ;;  %v700_v56 = vmul.f32 %v572_v45, %v572_v45  ;;  %v330_v44 = vld [vmem:[%s1338_s3 + $0x3f0] sm:$0xff] }
 0x11b   : > { %v458_v45 = vld [vmem:[%s1345_s29 + $0x3f0] sm:$0xff] }
 0x11c   : > { %v814_v2 = vadd.f32 %v813_v61, %v687_v55  ;;  %v574_v55 = vsub.f32 %v318_v48, %v446_v49  ;;  %v701_v61 = vmul.f32 %v573_v50, %v573_v50  ;;  %v331_v49 = vld [vmem:[%s1338_s3 + $0x3f8] sm:$0xff] }
 0x11d   : > { %v459_v50 = vld [vmem:[%s1345_s29 + $0x3f8] sm:$0xff] }
 0x11e   : > { %v815_v7 = vadd.f32 %v814_v2, %v688_v60  ;;  %v575_v60 = vsub.f32 %v319_v53, %v447_v54  ;;  %v702_v2 = vmul.f32 %v574_v55, %v574_v55  ;;  %v587_v54 = vsub.f32 %v331_v49, %v459_v50 }
 0x120   : > { %v816_v12 = vadd.f32 %v815_v7, %v689_v1  ;;  %v576_v1 = vsub.f32 %v320_v58, %v448_v59  ;;  %v703_v7 = vmul.f32 %v575_v60, %v575_v60  ;;  %v715_v59 = vmul.f32 %v587_v54, %v587_v54 }
 0x122   : > { %v817_v17 = vadd.f32 %v816_v12, %v690_v6  ;;  %v577_v6 = vsub.f32 %v321_v63, %v449_v0  ;;  %v704_v12 = vmul.f32 %v576_v1, %v576_v1 }
 0x124   : > { %v818_v22 = vadd.f32 %v817_v17, %v691_v11  ;;  %v578_v11 = vsub.f32 %v322_v4, %v450_v5  ;;  %v705_v17 = vmul.f32 %v577_v6, %v577_v6 }
 0x126   : > { %v819_v27 = vadd.f32 %v818_v22, %v692_v16  ;;  %v579_v16 = vsub.f32 %v323_v9, %v451_v10  ;;  %v706_v22 = vmul.f32 %v578_v11, %v578_v11 }
 0x128   : > { %v820_v32 = vadd.f32 %v819_v27, %v693_v21  ;;  %v580_v21 = vsub.f32 %v324_v14, %v452_v15  ;;  %v707_v27 = vmul.f32 %v579_v16, %v579_v16 }
 0x12a   : > { %v821_v37 = vadd.f32 %v820_v32, %v694_v26  ;;  %v581_v26 = vsub.f32 %v325_v19, %v453_v20  ;;  %v708_v32 = vmul.f32 %v580_v21, %v580_v21 }
 0x12c   : > { %v822_v42 = vadd.f32 %v821_v37, %v695_v31  ;;  %v582_v31 = vsub.f32 %v326_v24, %v454_v25  ;;  %v709_v37 = vmul.f32 %v581_v26, %v581_v26 }
 0x12e   : > { %v823_v47 = vadd.f32 %v822_v42, %v696_v36  ;;  %v583_v36 = vsub.f32 %v327_v29, %v455_v30  ;;  %v710_v42 = vmul.f32 %v582_v31, %v582_v31 }
 0x130   : > { %v824_v52 = vadd.f32 %v823_v47, %v697_v41  ;;  %v584_v41 = vsub.f32 %v328_v34, %v456_v35  ;;  %v711_v47 = vmul.f32 %v583_v36, %v583_v36 }
 0x132   : > { %v825_v57 = vadd.f32 %v824_v52, %v698_v46  ;;  %v585_v46 = vsub.f32 %v329_v39, %v457_v40  ;;  %v712_v52 = vmul.f32 %v584_v41, %v584_v41 }
 0x134   : > { %v826_v62 = vadd.f32 %v825_v57, %v699_v51  ;;  %v586_v51 = vsub.f32 %v330_v44, %v458_v45  ;;  %v713_v55 = vmul.f32 %v585_v46, %v585_v46 }
 0x136   : > { %v827_v3 = vadd.f32 %v826_v62, %v700_v56  ;;  %v714_v57 = vmul.f32 %v586_v51, %v586_v51 }
 0x138   : > { %v828_v8 = vadd.f32 %v827_v3, %v701_v61 }
 0x13a   : > { %v829_v13 = vadd.f32 %v828_v8, %v702_v2 }
 0x13c   : > { %v830_v18 = vadd.f32 %v829_v13, %v703_v7 }
 0x13e   : > { %v831_v23 = vadd.f32 %v830_v18, %v704_v12 }
 0x140   : > { %v832_v28 = vadd.f32 %v831_v23, %v705_v17 }
 0x142   : > { %v833_v33 = vadd.f32 %v832_v28, %v706_v22 }
 0x144   : > { %v834_v38 = vadd.f32 %v833_v33, %v707_v27 }
 0x146   : > { %v835_v43 = vadd.f32 %v834_v38, %v708_v32 }
 0x148   : > { %v836_v48 = vadd.f32 %v835_v43, %v709_v37 }
 0x14a   : > { %v837_v53 = vadd.f32 %v836_v48, %v710_v42 }
 0x14c   : > { %v838_v56 = vadd.f32 %v837_v53, %v711_v47 }
 0x14e   : > { %v839_v58 = vadd.f32 %v838_v56, %v712_v52 }
 0x150   : > { %v840_v60 = vadd.f32 %v839_v58, %v713_v55 }
 0x152   : > { %v841_v61 = vadd.f32 %v840_v60, %v714_v57 }
 0x154   : > { %v842_v62 = vadd.f32 %v841_v61, %v715_v59 }
 0x156   : > { %843 = vst [vmem:[%s201_s6] sm:$0xff] %v842_v62 }
 0x157   : > { %1096 = shalt.err (!%p1093_p11)
}
 0x158   : > { %s1097_s8 = scalar_lea.hbm %s1612_s24, 128  ;;  %s1101_s4 = scalar_lea.hbm %s1657_s2, 512 }
 0x159   : > { %p1098_p7 = scmp.ne.s32.totalorder %s1612_s24, %s1097_s8  ;;  %p1102_p1 = scmp.lt.u32.totalorder %s1612_s24, %s1657_s2 }
 0x15a   : > { %p1103_p3 = scmp.lt.u32.totalorder %s1101_s4, %s1097_s8  ;;  %p1105_p12 = scmp.lt.u32.totalorder %s1097_s8, %s1612_s24 }
 0x15b   : > { %p1099_p8 = pnand %p1098_p7, %p1667_p0 }
 0x15c   : > { %p1104_p6 = por %p1103_p3, %p1102_p1 }
 0x15d   : > { %p1100_p13 = pneg %p1099_p8 }
 0x15e   : > { %p1106_p2 = por %p1105_p12, %p1104_p6 }
 0x160   : > { %p1107_p9 = pnand %p1106_p2, %p1100_p13 }
 0x162   : > { %1110 = shalt.err (!%p1107_p9)
}
 0x163   : > { %974 = dma.vmem_to_hbm [thread:$0]  (%p1667_p0), %s1614_s14, 128, %s1612_s24, %s845_s26  }
 0x164 PF: > { %p988_p4 = scmp.ge.s32.totalorder %s1153_s12, 2  ;;  %s870_s23 = sand.u32 1, %s1141_s9  }
 0x165   : > { %p1668_p5 = scmp.ne.s32.totalorder %s1663_s22, 0  ;;  %s871_s29 = scalar_lea.sflag [#allocation4], %s870_s23 }
 0x167   : > { %p984_p10 = pnand %p988_p4, %p1668_p5 }
 0x169   : > { %1136 = dma.done.wait (!%p984_p10), %s871_s29, 128  }
 0x16a   : > { %1138 = vsyncadd (!%p984_p10), %s871_s29, 4294967168  ;;  %p18_p11 = scmp.ge.s32.totalorder %s1200_s15, 6   ;;  %s1669_s9 = smov %s1145_s10 }
 0x16b   : > { %s1670_s10 = smov %s1149_s11  ;;  %s1671_s11 = smov %s1212_s18 }
 0x16c   : > { %s1672_s12 = smov %s1200_s15  ;;  %20 = sbr.rel (!%p18_p11) target bundleno = 7 (0x7), region = 86 }
 0x173   :  { %876 = vsyncpa [#allocation3], 1 }
 0x174   :  { %878 = vsyncpa [#allocation3 + $0x1], 1 }
 0x175   :  { %879 = vsyncpa [#allocation6], 1 }
 0x176   :  { %881 = vsyncpa [#allocation6 + $0x1], 1 }
 0x177   :  { %882 = vsyncpa [#allocation4], 1 }
 0x178   :  { %884 = vsyncpa [#allocation4 + $0x1], 1 }

</bundles_post_ra>
